<compile_context>
chip_gen: v7x
topology: tpu7x:2x2x1
jax: 0.10.0
libtpu: 0.0.40
codegen_flags: <defaults>
</compile_context>

<pallas_src>
import jax
import jax.numpy as jnp
from jax.experimental import pallas as pl
from jax.experimental.pallas import tpu as pltpu


def _make_kernel(num_hidden):
    """Builds a kernel for an MLP with `num_hidden` hidden layers."""

    def kernel(*refs):
        p1_ref, p2_ref, env_ref = refs[0], refs[1], refs[2]
        param_refs = refs[3:-1]
        out_ref = refs[-1]

        p1 = p1_ref[...]     # (P, T)  bf16
        p2 = p2_ref[...]     # (P, T)  bf16
        env = env_ref[...]   # (E, T)  bf16
        T = p1.shape[1]

        params = [r[...] for r in param_refs]
        w1pq, w1e, b1 = params[0], params[1], params[2]   # (H1,2P) bf16, (H1,E) bf16, (H1,1) f32

        # Shared env contribution: identical for both branches, computed once.
        e_term = jnp.dot(w1e, env, preferred_element_type=jnp.float32) + b1   # (H1, T) f32

        # Branch fusion: lanes [0:T] are branch(p1,p2), lanes [T:2T] are branch(p2,p1).
        # Build the collapsed first-layer input (2P, 2T) with well-aligned f32
        # concats (sublane concat at offset P=8 is (8,128)-tile aligned), then
        # downcast to bf16 for the MXU.
        p1f = p1.astype(jnp.float32)
        p2f = p2.astype(jnp.float32)
        top = jnp.concatenate([p1f, p2f], axis=1)    # (P, 2T)  "slot 1" player
        bot = jnp.concatenate([p2f, p1f], axis=1)    # (P, 2T)  "slot 2" player
        x = jnp.concatenate([top, bot], axis=0).astype(w1pq.dtype)   # (2P, 2T) bf16

        h = (jnp.dot(w1pq, x, preferred_element_type=jnp.float32)
             + jnp.concatenate([e_term, e_term], axis=1))            # (H1, 2T) f32
        h = jnp.maximum(h, 0.0)          # ReLU; Dropout == identity (eval)

        idx = 3
        for _ in range(num_hidden - 1):
            w, bb = params[idx], params[idx + 1]
            idx += 2
            h = jnp.maximum(
                jnp.dot(w, h.astype(w.dtype),
                        preferred_element_type=jnp.float32) + bb, 0.0)

        w_out, b_out = params[idx], params[idx + 1]
        logits = jnp.dot(w_out, h.astype(w_out.dtype),
                         preferred_element_type=jnp.float32) + b_out   # (1, 2T) f32

        l1 = logits[:, :T]
        l2 = logits[:, T:]
        # (sigmoid(l1) + 1 - sigmoid(l2)) / 2  ==  0.5*(sigmoid(l1) + sigmoid(-l2))
        out_ref[...] = 0.5 * (jax.nn.sigmoid(l1) + jax.nn.sigmoid(-l2))

    return kernel


def init_params(key, player_feature_size, env_feature_size, hidden_sizes):
    """Deterministic synthetic parameters.

    PyTorch Linear layout (out_features, in_features); weights are cast to
    bf16 (MXU operands), biases stay f32 with shape (out_features, 1) so they
    broadcast along the lane/batch axis. The first layer's weight is split
    into the player block W1_pq (H1, 2P) and the env block W1_e (H1, E).
    """
    P, E = player_feature_size, env_feature_size
    in_size = 2 * P + E
    params = []
    sizes = list(hidden_sizes) + [1]
    prev = in_size
    for li, h in enumerate(sizes):
        key, kw, kb = jax.random.split(key, 3)
        w = jax.random.normal(kw, (h, prev), dtype=jnp.float32) * 0.1
        b = jax.random.normal(kb, (h, 1), dtype=jnp.float32) * 0.1
        if li == 0:
            params += [w[:, :2 * P].astype(jnp.bfloat16),   # W1_pq
                       w[:, 2 * P:].astype(jnp.bfloat16),   # W1_e
                       b]
        else:
            params += [w.astype(jnp.bfloat16), b]
        prev = h
    return params


def symmetric_nn_forward(p1, p2, env, params, num_hidden, *, tile_b=2048):
    B, P = p1.shape
    E = env.shape[1]
    tile_b = min(tile_b, B)
    assert B % tile_b == 0, "batch must be a multiple of tile_b"
    assert tile_b == B or tile_b % 128 == 0, "tile_b must be a multiple of 128"
    grid = (B // tile_b,)

    # Batch-on-lanes layout (wrapper-side layout plumbing) + bf16 operands.
    p1_t = p1.T.astype(jnp.bfloat16)     # (P, B)
    p2_t = p2.T.astype(jnp.bfloat16)     # (P, B)
    env_t = env.T.astype(jnp.bfloat16)   # (E, B)

    kernel = _make_kernel(num_hidden)

    in_specs = [
        pl.BlockSpec((P, tile_b), lambda i: (0, i)),   # p1 (features, batch)
        pl.BlockSpec((P, tile_b), lambda i: (0, i)),   # p2
        pl.BlockSpec((E, tile_b), lambda i: (0, i)),   # env
    ]
    # Parameters: constant block index -> VMEM-resident across grid steps.
    for prm in params:
        in_specs.append(pl.BlockSpec(prm.shape, lambda i: (0, 0)))

    out_spec = pl.BlockSpec((1, tile_b), lambda i: (0, i))   # lane-dense output

    fn = pl.pallas_call(
        kernel,
        out_shape=jax.ShapeDtypeStruct((1, B), jnp.float32),
        grid=grid,
        in_specs=in_specs,
        out_specs=out_spec,
        compiler_params=pltpu.CompilerParams(
            dimension_semantics=("parallel",),
            vmem_limit_bytes=32 * 1024 * 1024),
    )
    out = fn(p1_t, p2_t, env_t, *params)   # (1, B)
    return out.reshape(B, 1)


def reference_forward(p1, p2, env, params, num_hidden):
    """Pure-JAX reference mirroring the PyTorch module (eval mode) with the
    same bf16-operand / f32-accumulate precision as the kernel."""
    p1 = p1.astype(jnp.bfloat16)
    p2 = p2.astype(jnp.bfloat16)
    env = env.astype(jnp.bfloat16)
    w1pq, w1e, b1 = params[0], params[1], params[2]

    def branch(a, b):
        x = jnp.concatenate([a, b], axis=1)          # (B, 2P)
        h = (jnp.dot(x, w1pq.T, preferred_element_type=jnp.float32)
             + jnp.dot(env, w1e.T, preferred_element_type=jnp.float32)
             + b1.T)
        h = jnp.maximum(h, 0.0)
        idx = 3
        for _ in range(num_hidden - 1):
            w, bb = params[idx], params[idx + 1]
            idx += 2
            h = jnp.maximum(
                jnp.dot(h.astype(w.dtype), w.T,
                        preferred_element_type=jnp.float32) + bb.T, 0.0)
        w_out, b_out = params[idx], params[idx + 1]
        logit = jnp.dot(h.astype(w_out.dtype), w_out.T,
                        preferred_element_type=jnp.float32) + b_out.T
        return jax.nn.sigmoid(logit)

    return (branch(p1, p2) + 1.0 - branch(p2, p1)) / 2.0


if __name__ == "__main__":
    # Small deterministic example; batch kept large enough for >=2 grid steps.
    batch = 1024
    player_feature_size = 8
    env_feature_size = 4
    hidden_sizes = [32, 16]

    key = jax.random.PRNGKey(0)
    k_p1, k_p2, k_env, k_params = jax.random.split(key, 4)

    p1 = jax.random.normal(k_p1, (batch, player_feature_size), dtype=jnp.float32)
    p2 = jax.random.normal(k_p2, (batch, player_feature_size), dtype=jnp.float32)
    env = jax.random.normal(k_env, (batch, env_feature_size), dtype=jnp.float32)

    params = init_params(k_params, player_feature_size, env_feature_size,
                         hidden_sizes)

    out = symmetric_nn_forward(p1, p2, env, params, len(hidden_sizes),
                               tile_b=512)     # 2 grid steps (v7x: 2 TCs)
    out = jax.block_until_ready(out)

    ref = reference_forward(p1, p2, env, params, len(hidden_sizes))
    assert out.shape == (batch, 1)
    assert jnp.allclose(out, ref, atol=1e-4, rtol=1e-4), "mismatch vs reference"

    print("KERNEL_OK")
</pallas_src>

<mosaic_0001>
module attributes {stable_mosaic.version = 11 : i64} {
  func.func @kernel(%arg0: i32, %arg1: memref<8x512xbf16, #tpu.memory_space<vmem>>, %arg2: memref<8x512xbf16, #tpu.memory_space<vmem>>, %arg3: memref<4x512xbf16, #tpu.memory_space<vmem>>, %arg4: memref<32x16xbf16, #tpu.memory_space<vmem>>, %arg5: memref<32x4xbf16, #tpu.memory_space<vmem>>, %arg6: memref<32x1xf32, #tpu.memory_space<vmem>>, %arg7: memref<16x32xbf16, #tpu.memory_space<vmem>>, %arg8: memref<16x1xf32, #tpu.memory_space<vmem>>, %arg9: memref<1x16xbf16, #tpu.memory_space<vmem>>, %arg10: memref<1x1xf32, #tpu.memory_space<vmem>>, %arg11: memref<1x512xf32, #tpu.memory_space<vmem>>) attributes {dimension_semantics = [#tpu.dimension_semantics<parallel>], iteration_bounds = array<i64: 2>, scalar_prefetch = 0 : i64, scratch_operands = 0 : i64, tpu.core_type = #tpu.core_type<tc>, window_params = [{transform_indices = @transform_0, window_bounds = array<i64: 8, 512>}, {transform_indices = @transform_1, window_bounds = array<i64: 8, 512>}, {transform_indices = @transform_2, window_bounds = array<i64: 4, 512>}, {pipeline_mode = #tpu.pipeline_mode<synchronous>, transform_indices = @transform_3, window_bounds = array<i64: 32, 16>}, {pipeline_mode = #tpu.pipeline_mode<synchronous>, transform_indices = @transform_4, window_bounds = array<i64: 32, 4>}, {pipeline_mode = #tpu.pipeline_mode<synchronous>, transform_indices = @transform_5, window_bounds = array<i64: 32, 1>}, {pipeline_mode = #tpu.pipeline_mode<synchronous>, transform_indices = @transform_6, window_bounds = array<i64: 16, 32>}, {pipeline_mode = #tpu.pipeline_mode<synchronous>, transform_indices = @transform_7, window_bounds = array<i64: 16, 1>}, {pipeline_mode = #tpu.pipeline_mode<synchronous>, transform_indices = @transform_8, window_bounds = array<i64: 1, 16>}, {pipeline_mode = #tpu.pipeline_mode<synchronous>, transform_indices = @transform_9, window_bounds = array<i64: 1, 1>}, {transform_indices = @transform_10, window_bounds = array<i64: 1, 512>}]} {
    %c0 = arith.constant 0 : index
    %c0_0 = arith.constant 0 : index
    %0 = vector.load %arg1[%c0, %c0_0] : memref<8x512xbf16, #tpu.memory_space<vmem>>, vector<8x512xbf16>
    %c0_1 = arith.constant 0 : index
    %c0_2 = arith.constant 0 : index
    %1 = vector.load %arg2[%c0_1, %c0_2] : memref<8x512xbf16, #tpu.memory_space<vmem>>, vector<8x512xbf16>
    %c0_3 = arith.constant 0 : index
    %c0_4 = arith.constant 0 : index
    %2 = vector.load %arg3[%c0_3, %c0_4] : memref<4x512xbf16, #tpu.memory_space<vmem>>, vector<4x512xbf16>
    %c0_5 = arith.constant 0 : index
    %c0_6 = arith.constant 0 : index
    %3 = vector.load %arg4[%c0_5, %c0_6] : memref<32x16xbf16, #tpu.memory_space<vmem>>, vector<32x16xbf16>
    %c0_7 = arith.constant 0 : index
    %c0_8 = arith.constant 0 : index
    %4 = vector.load %arg5[%c0_7, %c0_8] : memref<32x4xbf16, #tpu.memory_space<vmem>>, vector<32x4xbf16>
    %c0_9 = arith.constant 0 : index
    %c0_10 = arith.constant 0 : index
    %5 = vector.load %arg6[%c0_9, %c0_10] : memref<32x1xf32, #tpu.memory_space<vmem>>, vector<32x1xf32>
    %c0_11 = arith.constant 0 : index
    %c0_12 = arith.constant 0 : index
    %6 = vector.load %arg7[%c0_11, %c0_12] : memref<16x32xbf16, #tpu.memory_space<vmem>>, vector<16x32xbf16>
    %c0_13 = arith.constant 0 : index
    %c0_14 = arith.constant 0 : index
    %7 = vector.load %arg8[%c0_13, %c0_14] : memref<16x1xf32, #tpu.memory_space<vmem>>, vector<16x1xf32>
    %c0_15 = arith.constant 0 : index
    %c0_16 = arith.constant 0 : index
    %8 = vector.load %arg9[%c0_15, %c0_16] : memref<1x16xbf16, #tpu.memory_space<vmem>>, vector<1x16xbf16>
    %c0_17 = arith.constant 0 : index
    %c0_18 = arith.constant 0 : index
    %9 = vector.load %arg10[%c0_17, %c0_18] : memref<1x1xf32, #tpu.memory_space<vmem>>, vector<1x1xf32>
    %cst = arith.constant dense<0.000000e+00> : vector<32x512xf32>
    %10 = tpu.matmul %4, %2, %cst {dimension_numbers = #tpu.dot_dimension_numbers<[1], [0], [0], [1], [0, 0, 1, 1], [], []>} : vector<32x4xbf16>, vector<4x512xbf16>, vector<32x512xf32> -> vector<32x512xf32>
    %11 = vector.broadcast %5 : vector<32x1xf32> to vector<32x512xf32>
    %12 = arith.addf %10, %11 : vector<32x512xf32>
    %13 = arith.extf %0 : vector<8x512xbf16> to vector<8x512xf32>
    %14 = arith.extf %1 : vector<8x512xbf16> to vector<8x512xf32>
    %15 = tpu.concatenate %13, %14 in 1 : vector<8x512xf32>, vector<8x512xf32> -> vector<8x1024xf32>
    %16 = tpu.concatenate %14, %13 in 1 : vector<8x512xf32>, vector<8x512xf32> -> vector<8x1024xf32>
    %17 = tpu.concatenate %15, %16 in 0 : vector<8x1024xf32>, vector<8x1024xf32> -> vector<16x1024xf32>
    %18 = arith.truncf %17 : vector<16x1024xf32> to vector<16x1024xbf16>
    %cst_19 = arith.constant dense<0.000000e+00> : vector<32x1024xf32>
    %19 = tpu.matmul %3, %18, %cst_19 {dimension_numbers = #tpu.dot_dimension_numbers<[1], [0], [0], [1], [0, 0, 1, 1], [], []>} : vector<32x16xbf16>, vector<16x1024xbf16>, vector<32x1024xf32> -> vector<32x1024xf32>
    %20 = tpu.concatenate %12, %12 in 1 : vector<32x512xf32>, vector<32x512xf32> -> vector<32x1024xf32>
    %21 = arith.addf %19, %20 : vector<32x1024xf32>
    %cst_20 = arith.constant 0.000000e+00 : f32
    %22 = vector.broadcast %cst_20 : f32 to vector<32x1024xf32>
    %23 = arith.maximumf %21, %22 : vector<32x1024xf32>
    %24 = arith.truncf %23 : vector<32x1024xf32> to vector<32x1024xbf16>
    %cst_21 = arith.constant dense<0.000000e+00> : vector<16x1024xf32>
    %25 = tpu.matmul %6, %24, %cst_21 {dimension_numbers = #tpu.dot_dimension_numbers<[1], [0], [0], [1], [0, 0, 1, 1], [], []>} : vector<16x32xbf16>, vector<32x1024xbf16>, vector<16x1024xf32> -> vector<16x1024xf32>
    %26 = vector.broadcast %7 : vector<16x1xf32> to vector<16x1024xf32>
    %27 = arith.addf %25, %26 : vector<16x1024xf32>
    %cst_22 = arith.constant 0.000000e+00 : f32
    %28 = vector.broadcast %cst_22 : f32 to vector<16x1024xf32>
    %29 = arith.maximumf %27, %28 : vector<16x1024xf32>
    %30 = arith.truncf %29 : vector<16x1024xf32> to vector<16x1024xbf16>
    %cst_23 = arith.constant dense<0.000000e+00> : vector<1x1024xf32>
    %31 = tpu.matmul %8, %30, %cst_23 {dimension_numbers = #tpu.dot_dimension_numbers<[1], [0], [0], [1], [0, 0, 1, 1], [], []>} : vector<1x16xbf16>, vector<16x1024xbf16>, vector<1x1024xf32> -> vector<1x1024xf32>
    %32 = vector.broadcast %9 : vector<1x1xf32> to vector<1x1024xf32>
    %33 = arith.addf %31, %32 : vector<1x1024xf32>
    %34 = vector.extract_strided_slice %33 {offsets = [0, 0], sizes = [1, 512], strides = [1, 1]} : vector<1x1024xf32> to vector<1x512xf32>
    %35 = vector.extract_strided_slice %33 {offsets = [0, 512], sizes = [1, 512], strides = [1, 1]} : vector<1x1024xf32> to vector<1x512xf32>
    %36 = arith.negf %34 : vector<1x512xf32>
    %37 = math.exp %36 : vector<1x512xf32>
    %cst_24 = arith.constant 1.000000e+00 : f32
    %38 = vector.broadcast %cst_24 : f32 to vector<1x512xf32>
    %39 = arith.addf %38, %37 : vector<1x512xf32>
    %40 = arith.divf %38, %39 : vector<1x512xf32>
    %cst_25 = arith.constant 0.000000e+00 : f32
    %41 = vector.broadcast %cst_25 : f32 to vector<1x512xf32>
    %42 = arith.subf %41, %35 : vector<1x512xf32>
    %43 = arith.negf %42 : vector<1x512xf32>
    %44 = math.exp %43 : vector<1x512xf32>
    %cst_26 = arith.constant 1.000000e+00 : f32
    %45 = vector.broadcast %cst_26 : f32 to vector<1x512xf32>
    %46 = arith.addf %45, %44 : vector<1x512xf32>
    %47 = arith.divf %45, %46 : vector<1x512xf32>
    %48 = arith.addf %40, %47 : vector<1x512xf32>
    %cst_27 = arith.constant 5.000000e-01 : f32
    %49 = vector.broadcast %cst_27 : f32 to vector<1x512xf32>
    %50 = arith.mulf %49, %48 : vector<1x512xf32>
    %c0_28 = arith.constant 0 : index
    %c0_29 = arith.constant 0 : index
    %51 = vector.load %arg11[%c0_28, %c0_29] : memref<1x512xf32, #tpu.memory_space<vmem>>, vector<1x512xf32>
    tpu.vector_store %arg11[%c0_28, %c0_29], %50 {strides = array<i32>} : memref<1x512xf32, #tpu.memory_space<vmem>>, vector<1x512xf32>,
    return
  }
  func.func @transform_0(%arg0: i32) -> (i32, i32) {
    %c0_i32 = arith.constant 0 : i32
    %c0_i32_0 = arith.constant 0 : i32
    return %c0_i32, %arg0 : i32, i32
  }
  func.func @transform_1(%arg0: i32) -> (i32, i32) {
    %c0_i32 = arith.constant 0 : i32
    %c0_i32_0 = arith.constant 0 : i32
    return %c0_i32, %arg0 : i32, i32
  }
  func.func @transform_2(%arg0: i32) -> (i32, i32) {
    %c0_i32 = arith.constant 0 : i32
    %c0_i32_0 = arith.constant 0 : i32
    return %c0_i32, %arg0 : i32, i32
  }
  func.func @transform_3(%arg0: i32) -> (i32, i32) {
    %c0_i32 = arith.constant 0 : i32
    %c0_i32_0 = arith.constant 0 : i32
    %c0_i32_1 = arith.constant 0 : i32
    return %c0_i32, %c0_i32_0 : i32, i32
  }
  func.func @transform_4(%arg0: i32) -> (i32, i32) {
    %c0_i32 = arith.constant 0 : i32
    %c0_i32_0 = arith.constant 0 : i32
    %c0_i32_1 = arith.constant 0 : i32
    return %c0_i32, %c0_i32_0 : i32, i32
  }
  func.func @transform_5(%arg0: i32) -> (i32, i32) {
    %c0_i32 = arith.constant 0 : i32
    %c0_i32_0 = arith.constant 0 : i32
    %c0_i32_1 = arith.constant 0 : i32
    return %c0_i32, %c0_i32_0 : i32, i32
  }
  func.func @transform_6(%arg0: i32) -> (i32, i32) {
    %c0_i32 = arith.constant 0 : i32
    %c0_i32_0 = arith.constant 0 : i32
    %c0_i32_1 = arith.constant 0 : i32
    return %c0_i32, %c0_i32_0 : i32, i32
  }
  func.func @transform_7(%arg0: i32) -> (i32, i32) {
    %c0_i32 = arith.constant 0 : i32
    %c0_i32_0 = arith.constant 0 : i32
    %c0_i32_1 = arith.constant 0 : i32
    return %c0_i32, %c0_i32_0 : i32, i32
  }
  func.func @transform_8(%arg0: i32) -> (i32, i32) {
    %c0_i32 = arith.constant 0 : i32
    %c0_i32_0 = arith.constant 0 : i32
    %c0_i32_1 = arith.constant 0 : i32
    return %c0_i32, %c0_i32_0 : i32, i32
  }
  func.func @transform_9(%arg0: i32) -> (i32, i32) {
    %c0_i32 = arith.constant 0 : i32
    %c0_i32_0 = arith.constant 0 : i32
    %c0_i32_1 = arith.constant 0 : i32
    return %c0_i32, %c0_i32_0 : i32, i32
  }
  func.func @transform_10(%arg0: i32) -> (i32, i32) {
    %c0_i32 = arith.constant 0 : i32
    %c0_i32_0 = arith.constant 0 : i32
    return %c0_i32, %arg0 : i32, i32
  }
}

</mosaic_0001>

<bundles_post_ra>
// kernel: tpu_custom_call.1
= control target key start
LH: loop header
LB: loop body
LE: loop exit
PB: predicated region body
PF: predicated region fallthrough
CT: control target
= control target key end

     0   :  { %s2013_s0 = inlined_call_operand.vmem [shape: bf16[8,1024], index: 0, kind: input, shape index: {}]   ;;  %s2014_s1 = inlined_call_operand.vmem [shape: bf16[8,1024], index: 1, kind: input, shape index: {}]   ;;  %s2015_s2 = inlined_call_operand.vmem [shape: bf16[4,1024], index: 2, kind: input, shape index: {}]   ;;  %s2016_s3 = inlined_call_operand.vmem [shape: bf16[32,16], index: 3, kind: input, shape index: {}]   ;;  %s2017_s4 = inlined_call_operand.vmem [shape: bf16[32,4], index: 4, kind: input, shape index: {}]   ;;  %s2018_s5 = inlined_call_operand.vmem [shape: f32[32,1], index: 5, kind: input, shape index: {}]   ;;  %s2019_s6 = inlined_call_operand.vmem [shape: bf16[16,32], index: 6, kind: input, shape index: {}]   ;;  %s2020_s7 = inlined_call_operand.vmem [shape: f32[16,1], index: 7, kind: input, shape index: {}]   ;;  %s2021_s8 = inlined_call_operand.vmem [shape: bf16[1,16], index: 8, kind: input, shape index: {}]   ;;  %s2022_s9 = inlined_call_operand.<no memory space> [shape: f32[1,1], index: 9, kind: input, shape index: {}]   ;;  %s2023_s10 = inlined_call_operand.hbm [shape: f32[1,1024], index: 10, kind: output, shape index: {}]  }
   0x1   :  { %v15_v0 = vstv %s2022_s9 }
   0x2   :  { %16 = vst [vmem:[#allocation2] sm:$0x1] %v15_v0 }
   0x3   :  { %17 = vsyncpa [#allocation4], 0 }
   0x4   :  { %19 = vsyncpa [#allocation4 + $0x1], 0  ;;  %s1749_s15 = smov 0   ;;  %s1751_s16 = smov 0  }
   0x5   :  { %s1753_s17 = smov 0   ;;  %s1755_s18 = smov 0  }
   0x6 LB: > { %2025 = sst [smem:[#allocation6_spill]] %s1681_s17  ;;  %s1770_s9 = sadd.s32 4294967295, %s1685_s18   ;;  %s1685_s18 = sphi %s1755_s18, %s2033_s18   ;;  %s1681_s17 = sphi %s1753_s17, %s2030_s17   ;;  %s1677_s16 = sphi %s1751_s16, %s2032_s16   ;;  %s1673_s15 = sphi %s1749_s15, %s2031_s15  }
   0x7   : > { %s1481_s19 = sadd.s32 4294967294, %s1685_s18   ;;  %s1774_s20 = sadd.s32 1, %s1685_s18  }
   0x8   : > { %s257_s21 = sadd.s32 1, %s1681_s17  ;;  %s254_s22 = ssub.s32 %s1685_s18, %s1774_s20 }
   0x9   : > { %p267_p0 = scmp.ne.s32.totalorder %s1681_s17, %s1677_s16  ;;  %p255_p1 = scmp.eq.s32.totalorder %s254_s22, 0 }
   0xa   : > { %p268_p2 = scmp.eq.s32.totalorder %s1770_s9, 1  ;;  %p273_p3 = scmp.ne.s32.totalorder %s1677_s16, %s1673_s15 }
   0xb   : > { %p274_p4 = scmp.eq.s32.totalorder %s1481_s19, 1  ;;  %p1484_p7 = scmp.ge.s32.totalorder %s1685_s18, 1 }
   0xc   : > { %s1785_s23 = scalar_select %p255_p1, %s1681_s17, %s257_s21  }
   0xd   : > { %p1787_p5 = por %p268_p2, %p267_p0  ;;  %p1791_p6 = por %p274_p4, %p273_p3 }
   0xe   : > { %2026 = sst [smem:[#allocation7_spill]] %s1785_s23  ;;  %p340_p8 = scmp.lt.s32.totalorder %s1685_s18, 3 }
  0x10   : > { %p341_p9 = pnand %p1484_p7, %p340_p8 }
  0x11   : > { %s1486_s26 = sshll.u32 (!%p341_p9), %s1770_s9, 2  ;;  %v466_v1 = vlaneseq (!%p341_p9)  ;;  %v1687_v2 = vmov (!%p341_p9), 1983009808   ;;  %v1688_v4 = vmov (!%p341_p9), 0   ;;  %v421_v8 = vld [vmem:[%s2018_s5] sm:$0xff] (!%p341_p9)  ;;  %v423_v9 = vld [vmem:[%s2018_s5 + $0x10] sm:$0xff] (!%p341_p9) }
  0x12   : > { %344 = sbr.rel (%p341_p9) target bundleno = 798 (0x31e), region = 60  ;;  %p389_p10 = scmp.lt.s32.totalorder (!%p341_p9), %s1486_s26, 7  ;;  %v464_v3 = vunpack.c.l.s4 (!%p341_p9), %v1687_v2  ;;  %531 = vmatprep.mubr.bf16.mxu0 (!%p341_p9), %v1688_v4  ;;  %584 = vmatprep.mubr.bf16.mxu1 (!%p341_p9), %v1688_v4  ;;  %v422_v10 = vld [vmem:[%s2018_s5 + $0x8] sm:$0xff] (!%p341_p9)  ;;  %vm486_vm0 = vcmask (!%p341_p9), 1041408   ;;  %v424_v13 = vld [vmem:[%s2018_s5 + $0x18] sm:$0xff] (!%p341_p9)  ;;  %v1586_v25 = vld [vmem:[%s2017_s4] sm:$0xff] (!%p341_p9)  }
  0x13   : > { %v1801_v5 = vshrl.u32 (!%p341_p9), %v466_v1, 7  ;;  %1583 = vset.pattern.permute.xlu0 (!%p341_p9), %v1688_v4  ;;  %1584 = vset.pattern.permute.xlu1 (!%p341_p9), %v1688_v4  ;;  %v427_v27 = vld [vmem:[%s2020_s7] sm:$0xff] (!%p341_p9)  ;;  %vm479_vm1 = vcmask (!%p341_p9), 31744   ;;  %v428_v33 = vld [vmem:[%s2020_s7 + $0x8] sm:$0xff] (!%p341_p9)  ;;  %vm631_vm2 = vcmask (!%p341_p9), 130048   ;;  %vm913_vm3 = vcmask (!%p341_p9), 261120  }
  0x14   : > { %v465_v6 = vunpack.c.0.s8 (!%p341_p9), %v464_v3  ;;  %433 = vperm.xlu0 (!%p341_p9), %1583, %v421_v8   ;;  %443 = vperm.xlu1 (!%p341_p9), %1584, %v423_v9   ;;  %v430_v32 = vld [vmem:[#allocation2] sm:$0x1] (!%p341_p9)  ;;  %v1587_v34 = vld [vmem:[%s2017_s4 + $0x8] sm:$0xff] (!%p341_p9)   ;;  %s1540_s14 = sshll.u32 (!%p341_p9), %s1770_s9, 6  ;;  %vm1380_vm4 = vcmp.lt.s32.totalorder (!%p341_p9), %v466_v1, 512  ;;  %s1690_s9 = smov (!%p341_p9), [#allocation3]  }
  0x15   : > { %v1588_v35 = vld [vmem:[%s2016_s3] sm:$0xff] (!%p341_p9)   ;;  %v1589_v38 = vld [vmem:[%s2016_s3 + $0x8] sm:$0xff] (!%p341_p9)   ;;  %s1971_s29 = scalar_lea.hbm (!%p341_p9), %s2023_s10, %s1540_s14  ;;  %s1627_s12 = sshll.u32 (!%p341_p9), %s1690_s9, 4  ;;  %s1628_s12 = int_to_ptr.vmem [resolvable:$false] %s1627_s12 }
  0x16   : > { %v468_v7 = vsub.s32 (!%p341_p9), %v465_v6, %v1801_v5  ;;  %s1629_s13 = scalar_lea.vmem (!%p341_p9), %s1628_s12, 128 }
  0x18   : > { %438 = vperm.xlu0 (!%p341_p9), %1583, %v422_v10   ;;  %448 = vperm.xlu1 (!%p341_p9), %1584, %v424_v13  }
  0x19   : > { %s2035_s26 = smov (!%p389_p10, %s1486_s26), 7 }
  0x1a   : > { %s1487_s27 = sshll.u32 %s2035_s26, 2  ;;  %s1491_s28 = sshll.u32 %s2035_s26, 1 }
  0x1b   : > { %s404_s19 = scalar_lea.vmem %s2015_s2, %s1491_s28  ;;  %s392_s23 = scalar_lea.vmem %s2013_s0, %s1487_s27 }
  0x1c   : > { %v412_v11 = vld [vmem:[%s404_s19] sm:$0xff]  ;;  %s398_s11 = scalar_lea.vmem %s2014_s1, %s1487_s27  ;;  %v409_v17 = vld [vmem:[%s392_s23 + $0x8] sm:$0xff]  ;;  %900 = vperm.xlu0 %1583, %v427_v27   ;;  %905 = vperm.xlu1 %1584, %v428_v33   ;;  %s385_s28 = sand.u32 1, %s1677_s16  }
  0x1d   : > { %v408_v12 = vld [vmem:[%s392_s23] sm:$0xff]  ;;  %v469_v14 = vrot.slane %v412_v11, %v468_v7  ;;  %v462_v15 = vcombine.high %v412_v11, %v412_v11  ;;  %v411_v18 = vld [vmem:[%s398_s11 + $0x8] sm:$0xff]  ;;  %s1485_s23 = sshll.u32 %s385_s28, 2  ;;  %s1384_s30 = scalar_lea.sflag [#allocation4], %s385_s28 }
  0x1e   : > { %v410_v16 = vld [vmem:[%s398_s11] sm:$0xff]  ;;  %v1503_v26 = vcombine.high %v409_v17, %v411_v18  ;;  %v1502_v30 = vcombine.low %v409_v17, %v411_v18  ;;  %v1507_v31 = vcombine.high %v411_v18, %v409_v17  ;;  %v1506_v37 = vcombine.low %v411_v18, %v409_v17  ;;  %s387_s19 = scalar_lea.vmem [#allocation3], %s1485_s23 }
  0x1f   : > { %v477_v19 = vcombine.high %v469_v14, %v469_v14  ;;  %v488_v20 = vsel %vm486_vm0, %v469_v14, 0  ;;  %v476_v21 = vrot.slane %v462_v15, %v468_v7  ;;  %v1501_v22 = vcombine.high %v408_v12, %v410_v16  ;;  %s1398_s21 = sshll.u32 %s387_s19, 4  ;;  %s1973_s21 = int_to_ptr.vmem [resolvable:$true] %s1398_s21 }
  0x20   : > { %v1500_v28 = vcombine.low %v408_v12, %v410_v16  ;;  %v1505_v29 = vcombine.high %v410_v16, %v408_v12  ;;  %1115 = vperm.xlu0 %1583, %v430_v32   ;;  %v1504_v36 = vcombine.low %v410_v16, %v408_v12  ;;  %s1623_s11 = scalar_lea.vmem %s1973_s21, 64  ;;  %p1630_p0 = scmp.lt.s32.totalorder %s1973_s21, %s1628_s12 }
  0x21   : > { %1494 = vmatprep.subr.msk.bf16.mxu0 %vm486_vm0, %v477_v19  ;;  %v478_v23 = vcombine.high %v476_v21, %v476_v21  ;;  %v494_v24 = vsel %vm486_vm0, %v476_v21, 0  ;;  %p1624_p11 = scmp.ne.s32.totalorder %s1973_s21, %s1623_s11  ;;  %p1631_p1 = scmp.lt.s32.totalorder %s1629_s13, %s1623_s11 }
  0x22   : > { %500 = vmatpush1.bf16.msra.mxu0 %v488_v20 }
  0x23   : > { %1497 = vmatprep.subr.msk.bf16.mxu1 %vm486_vm0, %v478_v23  ;;  %638 = vmatprep.subr.bf16.mxu0 %v1501_v22  ;;  %p1625_p12 = pnand %p1624_p11, %p1787_p5  ;;  %p1632_p2 = por %p1631_p1, %p1630_p0 }
  0x24   : > { %553 = vmatpush1.bf16.msra.mxu1 %v494_v24 }
  0x25   : > { %1495 = vmatmul.mubr.msk.bf16.vlgmr.msra.gmra.mrb[0].mxu0 %vm479_vm1, %v1586_v25  ;;  %691 = vmatprep.subr.bf16.mxu1 %v1503_v26  ;;  %p1626_p13 = pneg %p1625_p12 }
  0x26   : > { %541 = vmatprep.mubr.bf16.mxu0 %v1688_v4  ;;  %639 = vmatpush1.bf16.msra.mxu0 %v1500_v28 }
  0x27   : > { %1498 = vmatmul.mubr.msk.bf16.vlgmr.msra.gmra.mrb[0].mxu1 %vm479_vm1, %v1586_v25  ;;  %744 = vmatprep.subr.bf16.mxu0 %v1505_v29  ;;  %p1633_p3 = pnand %p1632_p2, %p1626_p13 }
  0x28   : > { %692 = vmatpush1.bf16.msra.mxu1 %v1502_v30  ;;  %594 = vmatprep.mubr.bf16.mxu1 %v1688_v4 }
  0x29   : > { %797 = vmatprep.subr.bf16.mxu1 %v1507_v31 }
  0x2d   : > { %1496 = vmatmul.mubr.msk.bf16.gmra.mrb[4].mxu0 %vm479_vm1, %v1587_v34 }
  0x2e   : > { %670 = vmatprep.mubr.bf16.mxu0 %v1688_v4 }
  0x2f   : > { %1499 = vmatmul.mubr.msk.bf16.gmra.mrb[4].mxu1 %vm479_vm1, %v1587_v34 }
  0x30   : > { %723 = vmatprep.mubr.bf16.mxu1 %v1688_v4 }
  0x35   : > { %1510 = vmatmul.mubr.msk.bf16.vlgmr.msra.gmra.mrb[8].mxu0 %vm631_vm2, %v1588_v35 }
  0x36   : > { %680 = vmatprep.mubr.bf16.mxu0 %v1688_v4  ;;  %745 = vmatpush1.bf16.msra.mxu0 %v1504_v36 }
  0x37   : > { %1512 = vmatmul.mubr.msk.bf16.vlgmr.msra.gmra.mrb[8].mxu1 %vm631_vm2, %v1588_v35 }
  0x38   : > { %798 = vmatpush1.bf16.msra.mxu1 %v1506_v37  ;;  %733 = vmatprep.mubr.bf16.mxu1 %v1688_v4 }
  0x3d   : > { %1511 = vmatmul.mubr.msk.bf16.gmra.mrb[12].mxu0 %vm631_vm2, %v1589_v38 }
  0x3e   : > { %776 = vmatprep.mubr.bf16.mxu0 %v1688_v4 }
  0x3f   : > { %1513 = vmatmul.mubr.msk.bf16.gmra.mrb[12].mxu1 %vm631_vm2, %v1589_v38 }
  0x40   : > { %829 = vmatprep.mubr.bf16.mxu1 %v1688_v4 }
  0x45   : > { %1514 = vmatmul.mubr.msk.bf16.vlgmr.msra.gmra.mrb[16].mxu0 %vm631_vm2, %v1588_v35 }
  0x46   : > { %786 = vmatprep.mubr.bf16.mxu0 %v1688_v4 }
  0x47   : > { %1516 = vmatmul.mubr.msk.bf16.vlgmr.msra.gmra.mrb[16].mxu1 %vm631_vm2, %v1588_v35 }
  0x48   : > { %839 = vmatprep.mubr.bf16.mxu1 %v1688_v4 }
  0x4d   : > { %1515 = vmatmul.mubr.msk.bf16.gmra.mrb[20].mxu0 %vm631_vm2, %v1589_v38 }
  0x4e   : > { %949 = vmatprep.mubr.bf16.mxu0 %v1688_v4 }
  0x4f   : > { %1517 = vmatmul.mubr.msk.bf16.gmra.mrb[20].mxu1 %vm631_vm2, %v1589_v38 }
  0x50   : > { %992 = vmatprep.mubr.bf16.mxu1 %v1688_v4 }
  0x93   : > { %v434_v47 = vpop.permute.xlu0 %433  ;;  %v444_v59 = vpop.permute.xlu1 %443 }
  0x97   : > { %v439_v56 = vpop.permute.xlu0 %438  ;;  %v449_v22 = vpop.permute.xlu1 %448 }
  0xf8   : > { %v533_v39 = vpop.f32.mrb[0].mxu0 }
  0xf9   : > { %v535_v40 = vpop.f32.mrb[1].mxu0  ;;  %v1873_v57 = vadd.f32 %v533_v39, %v434_v47 }
  0xfa   : > { %v537_v41 = vpop.f32.mrb[2].mxu0  ;;  %v586_v42 = vpop.f32.mrb[0].mxu1  ;;  %v1875_v58 = vadd.f32 %v535_v40, %v434_v47 }
  0xfb   : > { %v539_v43 = vpop.f32.mrb[3].mxu0  ;;  %v588_v44 = vpop.f32.mrb[1].mxu1  ;;  %v1877_v61 = vadd.f32 %v537_v41, %v439_v56  ;;  %v1879_v62 = vadd.f32 %v586_v42, %v434_v47 }
  0xfc   : > { %v590_v45 = vpop.f32.mrb[2].mxu1  ;;  %v1882_v2 = vadd.f32 %v539_v43, %v439_v56  ;;  %v1884_v3 = vadd.f32 %v588_v44, %v434_v47 }
  0xfd   : > { %v592_v46 = vpop.f32.mrb[3].mxu1  ;;  %v1887_v9 = vadd.f32 %v590_v45, %v439_v56 }
  0xfe   : > { %v1891_v14 = vadd.f32 %v592_v46, %v439_v56 }
 0x100   : > { %v543_v48 = vpop.f32.mrb[4].mxu0 }
 0x101   : > { %v545_v49 = vpop.f32.mrb[5].mxu0  ;;  %v1897_v26 = vadd.f32 %v543_v48, %v444_v59 }
 0x102   : > { %v547_v50 = vpop.f32.mrb[6].mxu0  ;;  %v596_v51 = vpop.f32.mrb[4].mxu1  ;;  %v1899_v30 = vadd.f32 %v545_v49, %v444_v59 }
 0x103   : > { %v549_v52 = vpop.f32.mrb[7].mxu0  ;;  %v598_v53 = vpop.f32.mrb[5].mxu1  ;;  %v1901_v35 = vadd.f32 %v547_v50, %v449_v22  ;;  %v1903_v36 = vadd.f32 %v596_v51, %v444_v59 }
 0x104   : > { %v600_v54 = vpop.f32.mrb[6].mxu1  ;;  %v1906_v40 = vadd.f32 %v549_v52, %v449_v22  ;;  %v1908_v41 = vadd.f32 %v598_v53, %v444_v59 }
 0x105   : > { %v602_v55 = vpop.f32.mrb[7].mxu1  ;;  %v1911_v46 = vadd.f32 %v600_v54, %v449_v22 }
 0x106   : > { %v1915_v51 = vadd.f32 %v602_v55, %v449_v22 }
 0x108   : > { %v672_v60 = vpop.f32.mrb[8].mxu0 }
 0x109   : > { %v673_v63 = vadd.f32 %v672_v60, %v1873_v57  ;;  %v674_v0 = vpop.f32.mrb[9].mxu0 }
 0x10a   : > { %v675_v6 = vadd.f32 %v674_v0, %v1875_v58  ;;  %v676_v7 = vpop.f32.mrb[10].mxu0  ;;  %v725_v8 = vpop.f32.mrb[8].mxu1 }
 0x10b   : > { %v677_v10 = vadd.f32 %v676_v7, %v1877_v61  ;;  %v726_v11 = vadd.f32 %v725_v8, %v1879_v62  ;;  %v678_v12 = vpop.f32.mrb[11].mxu0  ;;  %v727_v13 = vpop.f32.mrb[9].mxu1  ;;  %v850_v18 = vmax.f32 %v673_v63, 0.0 }
 0x10c   : > { %v679_v15 = vadd.f32 %v678_v12, %v1882_v2  ;;  %v728_v16 = vadd.f32 %v727_v13, %v1884_v3  ;;  %v729_v17 = vpop.f32.mrb[10].mxu1  ;;  %v851_v23 = vmax.f32 %v675_v6, 0.0 }
 0x10d   : > { %v858_v19 = vmax.f32 %v677_v10, 0.0  ;;  %v730_v20 = vadd.f32 %v729_v17, %v1887_v9  ;;  %v731_v21 = vpop.f32.mrb[11].mxu1  ;;  %v852_v28 = vmax.f32 %v726_v11, 0.0 }
 0x10e   : > { %v859_v24 = vmax.f32 %v679_v15, 0.0  ;;  %v732_v25 = vadd.f32 %v731_v21, %v1891_v14  ;;  %v853_v32 = vmax.f32 %v728_v16, 0.0 }
 0x10f   : > { %v882_v27 = vpack.c.bf16 %v858_v19, %v850_v18  ;;  %v860_v29 = vmax.f32 %v730_v20, 0.0 }
 0x110   : > { %v883_v31 = vpack.c.bf16 %v859_v24, %v851_v23  ;;  %v861_v33 = vmax.f32 %v732_v25, 0.0  ;;  %v682_v34 = vpop.f32.mrb[12].mxu0  ;;  %v1926_v23 = vld [vmem:[%s2019_s6] sm:$0xff]  }
 0x111   : > { %v884_v37 = vpack.c.bf16 %v860_v29, %v852_v28  ;;  %v683_v38 = vadd.f32 %v682_v34, %v1897_v26  ;;  %v684_v39 = vpop.f32.mrb[13].mxu0 }
 0x112   : > { %v885_v42 = vpack.c.bf16 %v861_v33, %v853_v32  ;;  %v685_v43 = vadd.f32 %v684_v39, %v1899_v30  ;;  %v686_v44 = vpop.f32.mrb[14].mxu0  ;;  %v735_v45 = vpop.f32.mrb[12].mxu1  ;;  %917 = vmatprep.subr.bf16.mxu0 %v883_v31 }
 0x113   : > { %v687_v47 = vadd.f32 %v686_v44, %v1901_v35  ;;  %v736_v48 = vadd.f32 %v735_v45, %v1903_v36  ;;  %v688_v49 = vpop.f32.mrb[15].mxu0  ;;  %v737_v50 = vpop.f32.mrb[13].mxu1  ;;  %918 = vmatpush1.bf16.msra.mxu0 %v882_v27  ;;  %v866_v59 = vmax.f32 %v683_v38, 0.0 }
 0x114   : > { %v689_v52 = vadd.f32 %v688_v49, %v1906_v40  ;;  %v738_v53 = vadd.f32 %v737_v50, %v1908_v41  ;;  %v739_v56 = vpop.f32.mrb[14].mxu1  ;;  %960 = vmatprep.subr.bf16.mxu1 %v885_v42  ;;  %v867_v0 = vmax.f32 %v685_v43, 0.0 }
 0x115   : > { %v874_v60 = vmax.f32 %v687_v47, 0.0  ;;  %v740_v54 = vadd.f32 %v739_v56, %v1911_v46  ;;  %v741_v63 = vpop.f32.mrb[15].mxu1  ;;  %961 = vmatpush1.bf16.msra.mxu1 %v884_v37  ;;  %v868_v10 = vmax.f32 %v736_v48, 0.0 }
 0x116   : > { %v875_v6 = vmax.f32 %v689_v52, 0.0  ;;  %v742_v7 = vadd.f32 %v741_v63, %v1915_v51  ;;  %v869_v12 = vmax.f32 %v738_v53, 0.0 }
 0x117   : > { %v890_v8 = vpack.c.bf16 %v874_v60, %v866_v59  ;;  %v876_v55 = vmax.f32 %v740_v54, 0.0 }
 0x118   : > { %v891_v11 = vpack.c.bf16 %v875_v6, %v867_v0  ;;  %v877_v13 = vmax.f32 %v742_v7, 0.0  ;;  %v778_v15 = vpop.f32.mrb[16].mxu0 }
 0x119   : > { %v892_v16 = vpack.c.bf16 %v876_v55, %v868_v10  ;;  %v779_v17 = vadd.f32 %v778_v15, %v1873_v57  ;;  %v780_v18 = vpop.f32.mrb[17].mxu0  ;;  %v906_v15 = vpop.permute.xlu1 %905 }
 0x11a   : > { %v893_v19 = vpack.c.bf16 %v877_v13, %v869_v12  ;;  %v781_v20 = vadd.f32 %v780_v18, %v1875_v58  ;;  %v782_v21 = vpop.f32.mrb[18].mxu0  ;;  %v831_v22 = vpop.f32.mrb[16].mxu1  ;;  %919 = vmatprep.subr.bf16.mxu0 %v891_v11 }
 0x11b   : > { %v783_v24 = vadd.f32 %v782_v21, %v1877_v61  ;;  %v832_v25 = vadd.f32 %v831_v22, %v1879_v62  ;;  %v784_v27 = vpop.f32.mrb[19].mxu0  ;;  %v833_v28 = vpop.f32.mrb[17].mxu1  ;;  %920 = vmatpush1.bf16.msra.mxu0 %v890_v8  ;;  %v854_v31 = vmax.f32 %v779_v17, 0.0 }
 0x11c   : > { %v785_v57 = vadd.f32 %v784_v27, %v1882_v2  ;;  %v834_v58 = vadd.f32 %v833_v28, %v1884_v3  ;;  %v835_v29 = vpop.f32.mrb[18].mxu1  ;;  %962 = vmatprep.subr.bf16.mxu1 %v893_v19  ;;  %v855_v37 = vmax.f32 %v781_v20, 0.0 }
 0x11d   : > { %v862_v32 = vmax.f32 %v783_v24, 0.0  ;;  %v836_v33 = vadd.f32 %v835_v29, %v1887_v9  ;;  %v837_v34 = vpop.f32.mrb[19].mxu1  ;;  %963 = vmatpush1.bf16.msra.mxu1 %v892_v16  ;;  %v856_v39 = vmax.f32 %v832_v25, 0.0 }
 0x11e   : > { %v863_v61 = vmax.f32 %v785_v57, 0.0  ;;  %v838_v62 = vadd.f32 %v837_v34, %v1891_v14  ;;  %1519 = vmatmul.mubr.msk.bf16.vlgmr.msra.gmra.mrb[24].mxu0 %vm913_vm3, %v1926_v23  ;;  %v857_v42 = vmax.f32 %v834_v58, 0.0 }
 0x11f   : > { %v886_v38 = vpack.c.bf16 %v862_v32, %v854_v31  ;;  %v864_v2 = vmax.f32 %v836_v33, 0.0  ;;  %1035 = vmatprep.mubr.bf16.mxu0 %v1688_v4 }
 0x120   : > { %v887_v3 = vpack.c.bf16 %v863_v61, %v855_v37  ;;  %v865_v43 = vmax.f32 %v838_v62, 0.0  ;;  %v788_v44 = vpop.f32.mrb[20].mxu0  ;;  %1520 = vmatmul.mubr.msk.bf16.vlgmr.msra.gmra.mrb[24].mxu1 %vm913_vm3, %v1926_v23 }
 0x121   : > { %v888_v9 = vpack.c.bf16 %v864_v2, %v856_v39  ;;  %v789_v45 = vadd.f32 %v788_v44, %v1897_v26  ;;  %v790_v47 = vpop.f32.mrb[21].mxu0  ;;  %1078 = vmatprep.mubr.bf16.mxu1 %v1688_v4 }
 0x122   : > { %v889_v14 = vpack.c.bf16 %v865_v43, %v857_v42  ;;  %v791_v48 = vadd.f32 %v790_v47, %v1899_v30  ;;  %v792_v49 = vpop.f32.mrb[22].mxu0  ;;  %v841_v50 = vpop.f32.mrb[20].mxu1  ;;  %1003 = vmatprep.subr.bf16.mxu0 %v887_v3  ;;  %v429_v43 = vld [vmem:[%s2021_s8] sm:$0x1] }
 0x123   : > { %v793_v52 = vadd.f32 %v792_v49, %v1901_v35  ;;  %v842_v53 = vadd.f32 %v841_v50, %v1903_v36  ;;  %v794_v56 = vpop.f32.mrb[23].mxu0  ;;  %v843_v59 = vpop.f32.mrb[21].mxu1  ;;  %1004 = vmatpush1.bf16.msra.mxu0 %v886_v38  ;;  %v870_v63 = vmax.f32 %v789_v45, 0.0 }
 0x124   : > { %v795_v60 = vadd.f32 %v794_v56, %v1906_v40  ;;  %v844_v26 = vadd.f32 %v843_v59, %v1908_v41  ;;  %v845_v54 = vpop.f32.mrb[22].mxu1  ;;  %1046 = vmatprep.subr.bf16.mxu1 %v889_v14  ;;  %v871_v7 = vmax.f32 %v791_v48, 0.0 }
 0x125   : > { %v878_v0 = vmax.f32 %v793_v52, 0.0  ;;  %v846_v30 = vadd.f32 %v845_v54, %v1911_v46  ;;  %v847_v6 = vpop.f32.mrb[23].mxu1  ;;  %1047 = vmatpush1.bf16.msra.mxu1 %v888_v9  ;;  %v872_v10 = vmax.f32 %v842_v53, 0.0  ;;  %v901_v46 = vpop.permute.xlu0 %900 }
 0x126   : > { %v879_v8 = vmax.f32 %v795_v60, 0.0  ;;  %v848_v35 = vadd.f32 %v847_v6, %v1915_v51  ;;  %v873_v12 = vmax.f32 %v844_v26, 0.0 }
 0x127   : > { %v894_v36 = vpack.c.bf16 %v878_v0, %v870_v63  ;;  %v880_v55 = vmax.f32 %v846_v30, 0.0 }
 0x128   : > { %v895_v11 = vpack.c.bf16 %v879_v8, %v871_v7  ;;  %v881_v40 = vmax.f32 %v848_v35, 0.0 }
 0x129   : > { %v896_v13 = vpack.c.bf16 %v880_v55, %v872_v10 }
 0x12a   : > { %v897_v41 = vpack.c.bf16 %v881_v40, %v873_v12  ;;  %1005 = vmatprep.subr.bf16.mxu0 %v895_v11 }
 0x12b   : > { %1006 = vmatpush1.bf16.msra.mxu0 %v894_v36 }
 0x12c   : > { %1048 = vmatprep.subr.bf16.mxu1 %v897_v41  ;;  %v1116_v41 = vpop.permute.xlu0 %1115 }
 0x12d   : > { %1049 = vmatpush1.bf16.msra.mxu1 %v896_v13  ;;  %v1120_v13 = vsub.s32 0, %v1801_v5 }
 0x12e   : > { %1521 = vmatmul.mubr.msk.bf16.vlgmr.msra.gmra.mrb[28].mxu0 %vm913_vm3, %v1926_v23 }
 0x12f   : > { %1157 = vmatprep.mubr.bf16.mxu0 %v1688_v4 }
 0x130   : > { %1522 = vmatmul.mubr.msk.bf16.vlgmr.msra.gmra.mrb[28].mxu1 %vm913_vm3, %v1926_v23 }
 0x131   : > { %1198 = vmatprep.mubr.bf16.mxu1 %v1688_v4 }
 0x1f1   : > { %v951_v51 = vpop.f32.mrb[24].mxu0 }
 0x1f2   : > { %v952_v16 = vadd.f32 %v951_v51, %v901_v46  ;;  %v953_v17 = vpop.f32.mrb[25].mxu0 }
 0x1f3   : > { %v954_v18 = vadd.f32 %v953_v17, %v901_v46  ;;  %v955_v19 = vpop.f32.mrb[26].mxu0  ;;  %v994_v20 = vpop.f32.mrb[24].mxu1 }
 0x1f4   : > { %v956_v21 = vadd.f32 %v955_v19, %v906_v15  ;;  %v995_v22 = vadd.f32 %v994_v20, %v901_v46  ;;  %v957_v24 = vpop.f32.mrb[27].mxu0  ;;  %v996_v25 = vpop.f32.mrb[25].mxu1  ;;  %v1089_v58 = vmax.f32 %v952_v16, 0.0  ;;  %v1121_v19 = vrot.slane %v1116_v41, %v1120_v13 }
 0x1f5   : > { %v958_v27 = vadd.f32 %v957_v24, %v906_v15  ;;  %v997_v28 = vadd.f32 %v996_v25, %v901_v46  ;;  %v998_v57 = vpop.f32.mrb[26].mxu1  ;;  %v1090_v32 = vmax.f32 %v954_v18, 0.0 }
 0x1f6   : > { %v1097_v29 = vmax.f32 %v956_v21, 0.0  ;;  %v999_v23 = vadd.f32 %v998_v57, %v906_v15  ;;  %v1000_v31 = vpop.f32.mrb[27].mxu1  ;;  %v1091_v61 = vmax.f32 %v995_v22, 0.0 }
 0x1f7   : > { %v1098_v33 = vmax.f32 %v958_v27, 0.0  ;;  %v1001_v34 = vadd.f32 %v1000_v31, %v906_v15  ;;  %v1092_v39 = vmax.f32 %v997_v28, 0.0 }
 0x1f8   : > { %v1105_v37 = vpack.c.bf16 %v1097_v29, %v1089_v58  ;;  %v1099_v62 = vmax.f32 %v999_v23, 0.0 }
 0x1f9   : > { %v1106_v38 = vpack.c.bf16 %v1098_v33, %v1090_v32  ;;  %v1100_v2 = vmax.f32 %v1001_v34, 0.0 }
 0x1fa   : > { %v1107_v3 = vpack.c.bf16 %v1099_v62, %v1091_v61 }
 0x1fb   : > { %v1108_v42 = vpack.c.bf16 %v1100_v2, %v1092_v39  ;;  %1125 = vmatprep.subr.bf16.mxu0 %v1106_v38 }
 0x1fc   : > { %1126 = vmatpush1.bf16.msra.mxu0 %v1105_v37 }
 0x1fd   : > { %1166 = vmatprep.subr.bf16.mxu1 %v1108_v42 }
 0x1fe   : > { %1167 = vmatpush1.bf16.msra.mxu1 %v1107_v3 }
 0x1ff   : > { %1523 = vmatmul.mubr.msk.bf16.vlgmr.msra.gmra.mrb[32].mxu0 %vm631_vm2, %v429_v43 }
 0x200   : > { %1239 = vmatprep.mubr.bf16.mxu0 %v1688_v4 }
 0x201   : > { %v1037_v44 = vpop.f32.mrb[28].mxu0  ;;  %1524 = vmatmul.mubr.msk.bf16.vlgmr.msra.gmra.mrb[32].mxu1 %vm631_vm2, %v429_v43 }
 0x202   : > { %v1038_v9 = vadd.f32 %v1037_v44, %v901_v46  ;;  %v1039_v45 = vpop.f32.mrb[29].mxu0  ;;  %1280 = vmatprep.mubr.bf16.mxu1 %v1688_v4 }
 0x203   : > { %v1040_v47 = vadd.f32 %v1039_v45, %v901_v46  ;;  %v1041_v14 = vpop.f32.mrb[30].mxu0  ;;  %v1080_v48 = vpop.f32.mrb[28].mxu1 }
 0x204   : > { %v1042_v49 = vadd.f32 %v1041_v14, %v906_v15  ;;  %v1081_v50 = vadd.f32 %v1080_v48, %v901_v46  ;;  %v1043_v52 = vpop.f32.mrb[31].mxu0  ;;  %v1082_v53 = vpop.f32.mrb[29].mxu1  ;;  %v1093_v26 = vmax.f32 %v1038_v9, 0.0 }
 0x205   : > { %v1044_v56 = vadd.f32 %v1043_v52, %v906_v15  ;;  %v1083_v59 = vadd.f32 %v1082_v53, %v901_v46  ;;  %v1084_v60 = vpop.f32.mrb[30].mxu1  ;;  %v1094_v30 = vmax.f32 %v1040_v47, 0.0 }
 0x206   : > { %v1101_v54 = vmax.f32 %v1042_v49, 0.0  ;;  %v1085_v63 = vadd.f32 %v1084_v60, %v906_v15  ;;  %v1086_v0 = vpop.f32.mrb[31].mxu1  ;;  %v1095_v35 = vmax.f32 %v1081_v50, 0.0 }
 0x207   : > { %v1102_v6 = vmax.f32 %v1044_v56, 0.0  ;;  %v1087_v7 = vadd.f32 %v1086_v0, %v906_v15  ;;  %v1096_v10 = vmax.f32 %v1083_v59, 0.0 }
 0x208   : > { %v1109_v8 = vpack.c.bf16 %v1101_v54, %v1093_v26  ;;  %v1103_v4 = vmax.f32 %v1085_v63, 0.0 }
 0x209   : > { %v1110_v36 = vpack.c.bf16 %v1102_v6, %v1094_v30  ;;  %v1104_v55 = vmax.f32 %v1087_v7, 0.0 }
 0x20a   : > { %v1111_v11 = vpack.c.bf16 %v1103_v4, %v1095_v35 }
 0x20b   : > { %v1112_v12 = vpack.c.bf16 %v1104_v55, %v1096_v10  ;;  %1207 = vmatprep.subr.bf16.mxu0 %v1110_v36  ;;  %v1689_v10 = vmov 1966171168  }
 0x20c   : > { %1208 = vmatpush1.bf16.msra.mxu0 %v1109_v8  ;;  %v1356_v55 = vunpack.c.l.s4 %v1689_v10 }
 0x20d   : > { %1248 = vmatprep.subr.bf16.mxu1 %v1112_v12 }
 0x20e   : > { %1249 = vmatpush1.bf16.msra.mxu1 %v1111_v11 }
 0x20f   : > { %1525 = vmatmul.mubr.msk.bf16.vlgmr.msra.gmra.mrb[36].mxu0 %vm631_vm2, %v429_v43 }
 0x211   : > { %1526 = vmatmul.mubr.msk.bf16.vlgmr.msra.gmra.mrb[36].mxu1 %vm631_vm2, %v429_v43 }
 0x2d2   : > { %v1159_v40 = vpop.f32.mrb[32].mxu0 }
 0x2d3   : > { %v1161_v46 = vpop.f32.mrb[33].mxu0  ;;  %v1160_v21 = vadd.f32 %v1159_v40, %v1121_v19 }
 0x2d4   : > { %v1200_v51 = vpop.f32.mrb[32].mxu1  ;;  %v1163_v15 = vpop.f32.mrb[34].mxu0  ;;  %v1162_v22 = vadd.f32 %v1161_v46, %v1121_v19 }
 0x2d5   : > { %v1202_v16 = vpop.f32.mrb[33].mxu1  ;;  %v1164_v17 = vpop.f32.mrb[35].mxu0  ;;  %v1201_v24 = vadd.f32 %v1200_v51, %v1121_v19  ;;  %v1527_v27 = vmul.f32 -1.442695, %v1160_v21  ;;  %v1357_v51 = vunpack.c.0.s8 %v1356_v55 }
 0x2d6   : > { %v1204_v18 = vpop.f32.mrb[34].mxu1  ;;  %v1203_v25 = vadd.f32 %v1202_v16, %v1121_v19  ;;  %v1528_v28 = vmul.f32 -1.442695, %v1162_v22 }
 0x2d7   : > { %v1205_v20 = vpop.f32.mrb[35].mxu1  ;;  %v1529_v57 = vmul.f32 -1.442695, %v1201_v24  ;;  %1591 = vpow2.f32 %v1527_v27  ;;  %v1360_v24 = vsub.s32 %v1357_v51, %v1801_v5 }
 0x2d8   : > { %v1530_v58 = vmul.f32 -1.442695, %v1203_v25  ;;  %1593 = vpow2.f32 %v1528_v28 }
 0x2d9   : > { %1595 = vpow2.f32 %v1529_v57 }
 0x2da   : > { %1597 = vpow2.f32 %v1530_v58 }
 0x2e1   : > { %v1592_v48 = vpop.eup %1591 }
 0x2e2   : > { %v1241_v29 = vpop.f32.mrb[36].mxu0  ;;  %v1594_v49 = vpop.eup %1593  ;;  %v1301_v53 = vadd.f32 1.0, %v1592_v48 }
 0x2e3   : > { %v1242_v23 = vadd.f32 %v1241_v29, %v1121_v19  ;;  %v1243_v31 = vpop.f32.mrb[37].mxu0  ;;  %v1596_v50 = vpop.eup %1595  ;;  %v1302_v56 = vadd.f32 1.0, %v1594_v49 }
 0x2e4   : > { %v1244_v32 = vadd.f32 %v1243_v31, %v1121_v19  ;;  %v1282_v33 = vpop.f32.mrb[36].mxu1  ;;  %v1245_v34 = vpop.f32.mrb[38].mxu0  ;;  %v1303_v59 = vadd.f32 1.0, %v1596_v50 }
 0x2e5   : > { %v1313_v37 = vsub.f32 0.0, %v1242_v23  ;;  %v1283_v61 = vadd.f32 %v1282_v33, %v1121_v19  ;;  %v1284_v62 = vpop.f32.mrb[37].mxu1  ;;  %v1246_v38 = vpop.f32.mrb[39].mxu0 }
 0x2e6   : > { %v1314_v39 = vsub.f32 0.0, %v1244_v32  ;;  %v1285_v2 = vadd.f32 %v1284_v62, %v1121_v19  ;;  %v1286_v3 = vpop.f32.mrb[38].mxu1  ;;  %v1598_v52 = vpop.eup %1597 }
 0x2e7   : > { %v1531_v42 = vmul.f32 -1.442695, %v1313_v37  ;;  %v1315_v43 = vsub.f32 0.0, %v1283_v61  ;;  %v1287_v44 = vpop.f32.mrb[39].mxu1  ;;  %v1304_v60 = vadd.f32 1.0, %v1598_v52 }
 0x2e8   : > { %v1532_v9 = vmul.f32 -1.442695, %v1314_v39  ;;  %v1316_v45 = vsub.f32 0.0, %v1285_v2 }
 0x2e9   : > { %1599 = vpow2.f32 %v1531_v42  ;;  %v1533_v47 = vmul.f32 -1.442695, %v1315_v43 }
 0x2ea   : > { %1601 = vpow2.f32 %v1532_v9  ;;  %v1534_v14 = vmul.f32 -1.442695, %v1316_v45 }
 0x2eb   : > { %1603 = vpow2.f32 %v1533_v47 }
 0x2ec   : > { %1605 = vpow2.f32 %v1534_v14 }
 0x2ed   : > { %1607 = vrcp.f32 %v1301_v53 }
 0x2ee   : > { %1609 = vrcp.f32 %v1302_v56 }
 0x2ef   : > { %1611 = vrcp.f32 %v1303_v59 }
 0x2f0   : > { %1613 = vrcp.f32 %v1304_v60 }
 0x2f3   : > { %v1600_v26 = vpop.eup %1599 }
 0x2f4   : > { %v1602_v54 = vpop.eup %1601  ;;  %v1329_v63 = vadd.f32 1.0, %v1600_v26 }
 0x2f5   : > { %v1604_v0 = vpop.eup %1603  ;;  %v1330_v30 = vadd.f32 1.0, %v1602_v54 }
 0x2f6   : > { %v1606_v6 = vpop.eup %1605  ;;  %1615 = vrcp.f32 %v1329_v63  ;;  %v1331_v7 = vadd.f32 1.0, %v1604_v0 }
 0x2f7   : > { %1617 = vrcp.f32 %v1330_v30  ;;  %v1332_v8 = vadd.f32 1.0, %v1606_v6  ;;  %v1608_v35 = vpop.eup %1607 }
 0x2f8   : > { %1619 = vrcp.f32 %v1331_v7  ;;  %v1610_v4 = vpop.eup %1609 }
 0x2f9   : > { %1621 = vrcp.f32 %v1332_v8  ;;  %v1612_v36 = vpop.eup %1611 }
 0x2fa   : > { %v1614_v11 = vpop.eup %1613 }
 0x300   : > { %v1616_v12 = vpop.eup %1615 }
 0x301   : > { %v1618_v40 = vpop.eup %1617  ;;  %v1341_v13 = vadd.f32 %v1616_v12, %v1608_v35 }
 0x302   : > { %v1620_v41 = vpop.eup %1619  ;;  %v1342_v46 = vadd.f32 %v1618_v40, %v1610_v4 }
 0x303   : > { %v1622_v15 = vpop.eup %1621  ;;  %v1343_v16 = vadd.f32 %v1620_v41, %v1612_v36  ;;  %v1345_v17 = vmul.f32 0.5, %v1341_v13 }
 0x304   : > { %v1344_v18 = vadd.f32 %v1622_v15, %v1614_v11  ;;  %v1346_v19 = vmul.f32 0.5, %v1342_v46 }
 0x305   : > { %v1347_v20 = vmul.f32 0.5, %v1343_v16 }
 0x306   : > { %v1348_v21 = vmul.f32 0.5, %v1344_v18  ;;  %v1353_v22 = vcombine.low %v1345_v17, %v1346_v19 }
 0x308   : > { %v1354_v25 = vcombine.low %v1347_v20, %v1348_v21  ;;  %v1361_v27 = vrot.slane %v1353_v22, %v1360_v24 }
 0x30a   : > { %v1368_v28 = vrot.slane %v1354_v25, %v1360_v24 }
 0x30c   : > { %v1369_v57 = vcombine.low %v1361_v27, %v1368_v28 }
 0x30e   : > { %v1376_v58 = vrot.slane %v1369_v57, %v1360_v24 }
 0x310   : > { %1382 = vst.msk [vmem:[%s387_s19] sm:$0xf] %vm1380_vm4, %v1376_v58 }
 0x311   : > { %1636 = shalt.err (!%p1633_p3)
}
 0x312   : > { %s1637_s17 = scalar_lea.hbm %s1971_s29, 64  ;;  %s1641_s23 = scalar_lea.hbm %s2023_s10, 128 }
 0x313   : > { %p1638_p4 = scmp.ne.s32.totalorder %s1971_s29, %s1637_s17  ;;  %p1642_p9 = scmp.lt.u32.totalorder %s1971_s29, %s2023_s10 }
 0x314   : > { %p1643_p10 = scmp.lt.u32.totalorder %s1641_s23, %s1637_s17  ;;  %p1645_p12 = scmp.lt.u32.totalorder %s1637_s17, %s1971_s29 }
 0x315   : > { %p1639_p7 = pnand %p1638_p4, %p1787_p5 }
 0x316   : > { %p1644_p11 = por %p1643_p10, %p1642_p9 }
 0x317   : > { %p1640_p8 = pneg %p1639_p7 }
 0x318   : > { %p1646_p13 = por %p1645_p12, %p1644_p11 }
 0x31a   : > { %p1647_p0 = pnand %p1646_p13, %p1640_p8 }
 0x31c   : > { %1650 = shalt.err (!%p1647_p0)
}
 0x31d   : > { %1541 = dma.vmem_to_hbm [thread:$0]  (%p1787_p5), %s1973_s21, 64, %s1971_s29, %s1384_s30  }
 0x31e PF: > { %p1547_p1 = scmp.ge.s32.totalorder %s1685_s18, 2  ;;  %s1410_s22 = sand.u32 1, %s1673_s15  }
 0x31f   : > { %s1411_s26 = scalar_lea.sflag [#allocation4], %s1410_s22 }
 0x320   : > { %p1544_p2 = pnand %p1547_p1, %p1791_p6 }
 0x322   : > { %1668 = dma.done.wait (!%p1544_p2), %s1411_s26, 64  }
 0x323   : > { %1670 = vsyncadd (!%p1544_p2), %s1411_s26, 4294967232  ;;  %s2029_s11 = sld [smem:[#allocation6_spill]]  ;;  %s2030_s17 = sld [smem:[#allocation7_spill]] }
 0x324   : > { %p22_p3 = scmp.ge.s32.totalorder %s1774_s20, 4   ;;  %s2031_s15 = smov %s1677_s16 }
 0x325   : > { %s2033_s18 = smov %s1774_s20 }
 0x326   :  { %24 = sbr.rel (!%p22_p3) target bundleno = 6 (0x6), region = 101 }
 0x329   : > { %s2032_s16 = smov %s2029_s11 }
 0x32d   :  { %1416 = vsyncpa [#allocation4], 1 }
 0x32e   :  { %1418 = vsyncpa [#allocation4 + $0x1], 1 }

</bundles_post_ra>
